<compile_context>
chip_gen: v5e
topology: v5e:2x2
jax: 0.10.0
libtpu: 0.0.40
codegen_flags: <defaults>
</compile_context>

<pallas_src>
import jax
import jax.numpy as jnp
from jax.experimental import pallas as pl
from jax.experimental.pallas import tpu as pltpu


def _round_up(x, m):
    return ((x + m - 1) // m) * m


def policy_kernel(x_ref, w1_ref, b1_ref, w2_ref, b2_ref, out_ref):
    # affine1: (TB, in) @ (in, 128) + (1, 128)   -- bf16 MXU, f32 accumulate
    x = x_ref[...].astype(jnp.bfloat16)
    h = jnp.dot(x, w1_ref[...], preferred_element_type=jnp.float32) + b1_ref[...]

    # dropout (eval mode -> identity), then ReLU in f32
    h = jnp.maximum(h, 0.0)

    # affine2: (TB, 128) @ (128, Npad) + (1, Npad) -- bf16 MXU, f32 accumulate
    # Padded output columns have zero weights and bias = -1e30, so they
    # contribute exactly 0 to the softmax sum.
    s = jnp.dot(h.astype(jnp.bfloat16), w2_ref[...],
                preferred_element_type=jnp.float32) + b2_ref[...]

    # softmax over dim=1 (last dim), numerically stable, exact normalization
    m = jnp.max(s, axis=-1, keepdims=True)
    e = jnp.exp(s - m)
    denom = jnp.sum(e, axis=-1, keepdims=True)
    out_ref[...] = (e / denom).astype(out_ref.dtype)


def policy_forward(x, w1, b1, w2, b2, *, tb=None):
    """x: (B, input_size) f32. w1:(in,128), b1:(1,128), w2:(128,out), b2:(1,out).

    Weights are in (in, out) layout (PyTorch stores (out, in) and does x @ W.T).
    tb=None  -> single grid step over the whole batch (best on v5e/v6e).
    tb=ceil(B/2) -> grid=(2,), one step per TensorCore on v7x (megacore).
    """
    B, in_size = x.shape
    hidden = w1.shape[1]
    out_size = w2.shape[1]

    # --- lane-dense output: pad output dim to 128 lanes -------------------
    n_pad = _round_up(max(out_size, 128), 128)
    w1b = w1.astype(jnp.bfloat16)
    b1f = b1.astype(jnp.float32).reshape(1, hidden)
    w2b = jnp.concatenate(
        [w2.astype(jnp.bfloat16),
         jnp.zeros((hidden, n_pad - out_size), jnp.bfloat16)], axis=1)
    b2f = jnp.concatenate(
        [b2.astype(jnp.float32).reshape(1, out_size),
         jnp.full((1, n_pad - out_size), -1e30, jnp.float32)], axis=1)

    # --- batch: pad only to a sublane multiple of 8 ------------------------
    b_pad = _round_up(B, 8)
    if tb is None:
        tb_eff = b_pad                       # grid = (1,)
    else:
        tb_eff = min(_round_up(tb, 8), b_pad)
        b_pad = _round_up(B, tb_eff)
    x_p = x if b_pad == B else jnp.pad(x, ((0, b_pad - B), (0, 0)))
    grid = (b_pad // tb_eff,)

    out = pl.pallas_call(
        policy_kernel,
        out_shape=jax.ShapeDtypeStruct((b_pad, n_pad), jnp.float32),
        grid_spec=pltpu.PrefetchScalarGridSpec(
            num_scalar_prefetch=0,
            grid=grid,
            in_specs=[
                # x tile marches along the batch axis
                pl.BlockSpec((tb_eff, in_size), lambda i: (i, 0)),
                # params: constant index_map -> fetched once, stay resident
                pl.BlockSpec((in_size, hidden), lambda i: (0, 0)),
                pl.BlockSpec((1, hidden), lambda i: (0, 0)),
                pl.BlockSpec((hidden, n_pad), lambda i: (0, 0)),
                pl.BlockSpec((1, n_pad), lambda i: (0, 0)),
            ],
            out_specs=pl.BlockSpec((tb_eff, n_pad), lambda i: (i, 0)),
        ),
        compiler_params=pltpu.CompilerParams(
            dimension_semantics=("parallel",),   # megacore on v7x when grid=2
        ),
    )(x_p, w1b, b1f, w2b, b2f)

    return out[:B, :out_size]


def init_policy_params(key, input_size, hidden, output_size):
    """PyTorch nn.Linear default init: U(-1/sqrt(fan_in), 1/sqrt(fan_in))."""
    k1, k2, k3, k4 = jax.random.split(key, 4)
    bound1 = 1.0 / jnp.sqrt(jnp.float32(input_size))
    bound2 = 1.0 / jnp.sqrt(jnp.float32(hidden))
    # stored directly in (in, out) layout for the kernel
    w1 = jax.random.uniform(k1, (input_size, hidden), jnp.float32, -bound1, bound1)
    b1 = jax.random.uniform(k2, (1, hidden), jnp.float32, -bound1, bound1)
    w2 = jax.random.uniform(k3, (hidden, output_size), jnp.float32, -bound2, bound2)
    b2 = jax.random.uniform(k4, (1, output_size), jnp.float32, -bound2, bound2)
    return w1, b1, w2, b2


if __name__ == "__main__":
    B = 32           # small batch of observations
    INPUT_SIZE = 8   # observation dim
    HIDDEN = 128     # fixed by the module
    OUTPUT_SIZE = 4  # number of discrete actions

    key = jax.random.PRNGKey(0)
    kx, kp = jax.random.split(key)
    x = jax.random.normal(kx, (B, INPUT_SIZE), jnp.float32)
    w1, b1, w2, b2 = init_policy_params(kp, INPUT_SIZE, HIDDEN, OUTPUT_SIZE)

    probs = policy_forward(x, w1, b1, w2, b2)   # default: grid=(1,)
    probs = jax.block_until_ready(probs)

    # reference in plain JAX with the same bf16-matmul / f32-accumulate recipe
    h_ref = jnp.dot(x.astype(jnp.bfloat16), w1.astype(jnp.bfloat16),
                    preferred_element_type=jnp.float32) + b1
    h_ref = jnp.maximum(h_ref, 0.0)
    s_ref = jnp.dot(h_ref.astype(jnp.bfloat16), w2.astype(jnp.bfloat16),
                    preferred_element_type=jnp.float32) + b2
    ref = jax.nn.softmax(s_ref, axis=1)

    assert probs.shape == (B, OUTPUT_SIZE)
    # exact normalization -> rows sum to 1 at f32 precision
    assert jnp.allclose(jnp.sum(probs, axis=1), 1.0, atol=1e-5)
    # MXU vs XLA bf16 accumulation-order differences only
    assert jnp.allclose(probs, ref, atol=2e-3, rtol=2e-3)
    # sanity vs pure-f32 math (bf16 inputs only perturb the policy slightly)
    ref_f32 = jax.nn.softmax(jnp.maximum(x @ w1 + b1, 0.0) @ w2 + b2, axis=1)
    assert jnp.allclose(probs, ref_f32, atol=2e-2)

    print("KERNEL_OK")
</pallas_src>

<mosaic_0001>
module attributes {stable_mosaic.version = 11 : i64} {
  func.func @policy_kernel(%arg0: i32, %arg1: memref<32x8xf32, #tpu.memory_space<vmem>>, %arg2: memref<8x128xbf16, #tpu.memory_space<vmem>>, %arg3: memref<1x128xf32, #tpu.memory_space<vmem>>, %arg4: memref<128x128xbf16, #tpu.memory_space<vmem>>, %arg5: memref<1x128xf32, #tpu.memory_space<vmem>>, %arg6: memref<32x128xf32, #tpu.memory_space<vmem>>) attributes {dimension_semantics = [#tpu.dimension_semantics<parallel>], iteration_bounds = array<i64: 1>, scalar_prefetch = 0 : i64, scratch_operands = 0 : i64, tpu.core_type = #tpu.core_type<tc>, window_params = [{transform_indices = @transform_0, window_bounds = array<i64: 32, 8>}, {pipeline_mode = #tpu.pipeline_mode<synchronous>, transform_indices = @transform_1, window_bounds = array<i64: 8, 128>}, {pipeline_mode = #tpu.pipeline_mode<synchronous>, transform_indices = @transform_2, window_bounds = array<i64: 1, 128>}, {pipeline_mode = #tpu.pipeline_mode<synchronous>, transform_indices = @transform_3, window_bounds = array<i64: 128, 128>}, {pipeline_mode = #tpu.pipeline_mode<synchronous>, transform_indices = @transform_4, window_bounds = array<i64: 1, 128>}, {transform_indices = @transform_5, window_bounds = array<i64: 32, 128>}]} {
    %c0 = arith.constant 0 : index
    %c0_0 = arith.constant 0 : index
    %0 = vector.load %arg1[%c0, %c0_0] : memref<32x8xf32, #tpu.memory_space<vmem>>, vector<32x8xf32>
    %1 = arith.truncf %0 : vector<32x8xf32> to vector<32x8xbf16>
    %c0_1 = arith.constant 0 : index
    %c0_2 = arith.constant 0 : index
    %2 = vector.load %arg2[%c0_1, %c0_2] : memref<8x128xbf16, #tpu.memory_space<vmem>>, vector<8x128xbf16>
    %cst = arith.constant dense<0.000000e+00> : vector<32x128xf32>
    %3 = tpu.matmul %1, %2, %cst {dimension_numbers = #tpu.dot_dimension_numbers<[1], [0], [0], [1], [0, 0, 1, 1], [], []>} : vector<32x8xbf16>, vector<8x128xbf16>, vector<32x128xf32> -> vector<32x128xf32>
    %c0_3 = arith.constant 0 : index
    %c0_4 = arith.constant 0 : index
    %4 = vector.load %arg3[%c0_3, %c0_4] : memref<1x128xf32, #tpu.memory_space<vmem>>, vector<1x128xf32>
    %5 = vector.broadcast %4 : vector<1x128xf32> to vector<32x128xf32>
    %6 = arith.addf %3, %5 : vector<32x128xf32>
    %cst_5 = arith.constant 0.000000e+00 : f32
    %7 = vector.broadcast %cst_5 : f32 to vector<32x128xf32>
    %8 = arith.maximumf %6, %7 : vector<32x128xf32>
    %9 = arith.truncf %8 : vector<32x128xf32> to vector<32x128xbf16>
    %c0_6 = arith.constant 0 : index
    %c0_7 = arith.constant 0 : index
    %10 = vector.load %arg4[%c0_6, %c0_7] : memref<128x128xbf16, #tpu.memory_space<vmem>>, vector<128x128xbf16>
    %cst_8 = arith.constant dense<0.000000e+00> : vector<32x128xf32>
    %11 = tpu.matmul %9, %10, %cst_8 {dimension_numbers = #tpu.dot_dimension_numbers<[1], [0], [0], [1], [0, 0, 1, 1], [], []>} : vector<32x128xbf16>, vector<128x128xbf16>, vector<32x128xf32> -> vector<32x128xf32>
    %c0_9 = arith.constant 0 : index
    %c0_10 = arith.constant 0 : index
    %12 = vector.load %arg5[%c0_9, %c0_10] : memref<1x128xf32, #tpu.memory_space<vmem>>, vector<1x128xf32>
    %13 = vector.broadcast %12 : vector<1x128xf32> to vector<32x128xf32>
    %14 = arith.addf %11, %13 : vector<32x128xf32>
    %cst_11 = arith.constant dense<0xFF800000> : vector<32xf32>
    %15 = vector.multi_reduction <maximumf>, %14, %cst_11 [1] : vector<32x128xf32> to vector<32xf32>
    %16 = vector.shape_cast %15 : vector<32xf32> to vector<32x1xf32>
    %17 = vector.broadcast %16 : vector<32x1xf32> to vector<32x128xf32>
    %18 = arith.subf %14, %17 : vector<32x128xf32>
    %19 = math.exp %18 : vector<32x128xf32>
    %cst_12 = arith.constant dense<0.000000e+00> : vector<32xf32>
    %20 = vector.multi_reduction <add>, %19, %cst_12 [1] : vector<32x128xf32> to vector<32xf32>
    %21 = vector.shape_cast %20 : vector<32xf32> to vector<32x1xf32>
    %22 = vector.broadcast %21 : vector<32x1xf32> to vector<32x128xf32>
    %23 = arith.divf %19, %22 : vector<32x128xf32>
    %c0_13 = arith.constant 0 : index
    %c0_14 = arith.constant 0 : index
    %24 = vector.load %arg6[%c0_13, %c0_14] : memref<32x128xf32, #tpu.memory_space<vmem>>, vector<32x128xf32>
    tpu.vector_store %arg6[%c0_13, %c0_14], %23 {strides = array<i32>} : memref<32x128xf32, #tpu.memory_space<vmem>>, vector<32x128xf32>,
    return
  }
  func.func @transform_0(%arg0: i32) -> (i32, i32) {
    %c0_i32 = arith.constant 0 : i32
    %c0_i32_0 = arith.constant 0 : i32
    return %arg0, %c0_i32 : i32, i32
  }
  func.func @transform_1(%arg0: i32) -> (i32, i32) {
    %c0_i32 = arith.constant 0 : i32
    %c0_i32_0 = arith.constant 0 : i32
    %c0_i32_1 = arith.constant 0 : i32
    return %c0_i32, %c0_i32_0 : i32, i32
  }
  func.func @transform_2(%arg0: i32) -> (i32, i32) {
    %c0_i32 = arith.constant 0 : i32
    %c0_i32_0 = arith.constant 0 : i32
    %c0_i32_1 = arith.constant 0 : i32
    return %c0_i32, %c0_i32_0 : i32, i32
  }
  func.func @transform_3(%arg0: i32) -> (i32, i32) {
    %c0_i32 = arith.constant 0 : i32
    %c0_i32_0 = arith.constant 0 : i32
    %c0_i32_1 = arith.constant 0 : i32
    return %c0_i32, %c0_i32_0 : i32, i32
  }
  func.func @transform_4(%arg0: i32) -> (i32, i32) {
    %c0_i32 = arith.constant 0 : i32
    %c0_i32_0 = arith.constant 0 : i32
    %c0_i32_1 = arith.constant 0 : i32
    return %c0_i32, %c0_i32_0 : i32, i32
  }
  func.func @transform_5(%arg0: i32) -> (i32, i32) {
    %c0_i32 = arith.constant 0 : i32
    %c0_i32_0 = arith.constant 0 : i32
    return %arg0, %c0_i32 : i32, i32
  }
}

</mosaic_0001>

<bundles_post_ra>
// kernel: tpu_custom_call.1
= control target key start
LH: loop header
LB: loop body
LE: loop exit
PB: predicated region body
PF: predicated region fallthrough
CT: control target
= control target key end

     0   :  { %10 = vsyncpa [#allocation3], 0  ;;  %s482_s0 = inlined_call_operand.vmem [shape: f32[32,8], index: 0, kind: input, shape index: {}]   ;;  %s483_s1 = inlined_call_operand.vmem [shape: bf16[8,128], index: 1, kind: input, shape index: {}]   ;;  %s484_s2 = inlined_call_operand.vmem [shape: f32[1,128], index: 2, kind: input, shape index: {}]   ;;  %s485_s3 = inlined_call_operand.hbm [shape: bf16[128,128], index: 3, kind: input, shape index: {}]   ;;  %s486_s4 = inlined_call_operand.vmem [shape: f32[1,128], index: 4, kind: input, shape index: {}]   ;;  %s487_s5 = inlined_call_operand.hbm [shape: f32[32,128], index: 5, kind: output, shape index: {}]  }
   0x1   :  { %11 = vsyncpa [#allocation4], 0  ;;  %s22_s20 = sshll.u32 %s485_s3, 4  ;;  %s409_s21 = smov [#allocation2]   ;;  %s23_s20 = int_to_ptr.hbm [resolvable:$true] %s22_s20 }
   0x2   :  { %s24_s22 = sshll.u32 %s409_s21, 4  ;;  %s410_s23 = smov 64   ;;  %s25_s22 = int_to_ptr.vmem [resolvable:$true] %s24_s22 }
   0x3   :  { %s411_s24 = smov 4  }
   0x4   :  { %30 = dma.hbm_to_vmem [thread:$0]  %s23_s20, 1024, %s25_s22, [#allocation3], %s410_s23, %s410_s23, %s411_s24  }
   0x5   :  { %405 = dma.done.wait [#allocation3], 1024  }
   0x6   :  { %406 = vsyncadd [#allocation3], 4294966272  ;;  %vm56_vm0 = vcmask 1043456   ;;  %v44_v0 = vld [vmem:[%s483_s1] sm:$0xf]  ;;  %v39_v2 = vld [vmem:[%s482_s0 + $0x8] sm:$0xff] }
   0x7   :  { %v38_v1 = vld [vmem:[%s482_s0] sm:$0xff]  ;;  %v58_v3 = vsel %vm56_vm0, %v44_v0, 0  ;;  %v324_v5 = vld [vmem:[#allocation2 + $0x38] sm:$0xff]  ;;  %vm49_vm1 = vcmask 64512   ;;  %v323_v6 = vld [vmem:[#allocation2 + $0x30] sm:$0xff]  ;;  %s270_s13 = sshll.u32 %s487_s5, 4  ;;  %s271_s13 = int_to_ptr.hbm [resolvable:$true] %s270_s13 }
   0x8   :  { %v42_v4 = vpack.c.bf16 %v39_v2, %v38_v1  ;;  %67 = vmatpush.bf16.msra.mxu0 %v58_v3  ;;  %153 = vmatpush.bf16.msra.mxu1 %v324_v5  ;;  %v322_v7 = vld [vmem:[#allocation2 + $0x28] sm:$0xff]  ;;  %v321_v8 = vld [vmem:[#allocation2 + $0x20] sm:$0xff]  ;;  %v40_v9 = vld [vmem:[%s482_s0 + $0x10] sm:$0xff]  ;;  %s413_s14 = smov 128   ;;  %s414_s15 = smov 8  }
   0x9   :  { %325 = vmatpush.bf16.msra.mxu2 %v324_v5  ;;  %v41_v10 = vld [vmem:[%s482_s0 + $0x18] sm:$0xff]  ;;  %v319_v13 = vld [vmem:[#allocation2 + $0x10] sm:$0xff]  ;;  %v318_v14 = vld [vmem:[#allocation2 + $0x8] sm:$0xff] }
   0xa   :  { %v43_v11 = vpack.c.bf16 %v41_v10, %v40_v9  ;;  %v320_v12 = vld [vmem:[#allocation2 + $0x18] sm:$0xff]  ;;  %v317_v15 = vld [vmem:[#allocation2] sm:$0xff] }
   0xb   :  { %283 = vmatmul.msk.bf16.vlgmr.msra.gmra.mxu0 %vm49_vm1, %v42_v4  ;;  %v339_v17 = vld [vmem:[%s484_s2] ss:$0 sm:$0xff]  ;;  %s412_s2 = smov [#allocation5]  }
   0xc   :  { %154 = vmatpush.bf16.msra.mxu1 %v323_v6  ;;  %v340_v31 = vld [vmem:[%s486_s4] ss:$0 sm:$0xff]  ;;  %s268_s4 = sshll.u32 %s412_s2, 4  ;;  %s269_s4 = int_to_ptr.vmem [resolvable:$true] %s268_s4 }
   0xd   :  { %326 = vmatpush.bf16.msra.mxu2 %v323_v6 }
  0x10   :  { %155 = vmatpush.bf16.msra.mxu1 %v322_v7 }
  0x11   :  { %327 = vmatpush.bf16.msra.mxu2 %v322_v7 }
  0x14   :  { %156 = vmatpush.bf16.msra.mxu1 %v321_v8 }
  0x15   :  { %328 = vmatpush.bf16.msra.mxu2 %v321_v8 }
  0x18   :  { %157 = vmatpush.bf16.msra.mxu1 %v320_v12 }
  0x19   :  { %329 = vmatpush.bf16.msra.mxu2 %v320_v12 }
  0x1b   :  { %284 = vmatmul.msk.bf16.gmra.mxu0 %vm49_vm1, %v43_v11 }
  0x1c   :  { %158 = vmatpush.bf16.msra.mxu1 %v319_v13 }
  0x1d   :  { %330 = vmatpush.bf16.msra.mxu2 %v319_v13 }
  0x20   :  { %159 = vmatpush.bf16.msra.mxu1 %v318_v14 }
  0x21   :  { %331 = vmatpush.bf16.msra.mxu2 %v318_v14 }
  0x24   :  { %160 = vmatpush.bf16.msra.mxu1 %v317_v15 }
  0x25   :  { %332 = vmatpush.bf16.msra.mxu2 %v317_v15 }
  0x88   :  { %v69_v16 = vpop.f32.mrf.mxu0 }
  0x89   :  { %v70_v18 = vadd.f32 %v339_v17, %v69_v16 }
  0x8b   :  { %v79_v21 = vmax.f32 %v70_v18, 0.0 }
  0x90   :  { %v71_v19 = vpop.f32.mrf.mxu0 }
  0x91   :  { %v72_v20 = vadd.f32 %v339_v17, %v71_v19 }
  0x93   :  { %v80_v22 = vmax.f32 %v72_v20, 0.0 }
  0x95   :  { %v83_v23 = vpack.c.bf16 %v80_v22, %v79_v21 }
  0x97   :  { %161 = vmatmul.bf16.vlgmr.msra.gmra.mxu1 %v83_v23 }
  0x98   :  { %v74_v24 = vpop.f32.mrf.mxu0 }
  0x99   :  { %v75_v25 = vadd.f32 %v339_v17, %v74_v24 }
  0x9b   :  { %v81_v28 = vmax.f32 %v75_v25, 0.0 }
  0xa0   :  { %v76_v26 = vpop.f32.mrf.mxu0 }
  0xa1   :  { %v77_v27 = vadd.f32 %v339_v17, %v76_v26 }
  0xa3   :  { %v82_v29 = vmax.f32 %v77_v27, 0.0 }
  0xa5   :  { %v84_v30 = vpack.c.bf16 %v82_v29, %v81_v28 }
  0xa7   :  { %166 = vmatmul.bf16.vlgmr.msra.gmra.mxu2 %v84_v30 }
 0x114   :  { %v162_v32 = vpop.f32.mrf.mxu1 }
 0x115   :  { %v163_v33 = vadd.f32 %v340_v31, %v162_v32 }
 0x117   :  { %172 = vmax.xlane.f32.xlu0 %v163_v33 }
 0x11c   :  { %v164_v34 = vpop.f32.mrf.mxu1 }
 0x11d   :  { %v165_v35 = vadd.f32 %v340_v31, %v164_v34 }
 0x11f   :  { %174 = vmax.xlane.f32.xlu0 %v165_v35 }
 0x12a   :  { %v167_v36 = vpop.f32.mrf.mxu2 }
 0x12b   :  { %v168_v37 = vadd.f32 %v340_v31, %v167_v36 }
 0x12d   :  { %176 = vmax.xlane.f32.xlu1 %v168_v37 }
 0x132   :  { %v169_v38 = vpop.f32.mrf.mxu2 }
 0x133   :  { %v170_v39 = vadd.f32 %v340_v31, %v169_v38 }
 0x135   :  { %178 = vmax.xlane.f32.xlu1 %v170_v39 }
 0x18a   :  { %v173_v40 = vpop.xlane.xlu0 %172 }
 0x18b   :  { %v180_v41 = vsub.f32 %v163_v33, %v173_v40 }
 0x18d   :  { %v184_v42 = vmul.f32 1.442695, %v180_v41 }
 0x18f   :  { %341 = vpow2.f32 %v184_v42 }
 0x192   :  { %v175_v43 = vpop.xlane.xlu0 %174 }
 0x193   :  { %v181_v44 = vsub.f32 %v165_v35, %v175_v43 }
 0x195   :  { %v342_v45 = vpop.eup %341  ;;  %v186_v46 = vmul.f32 1.442695, %v181_v44 }
 0x196   :  { %192 = vadd.xlane.f32.xlu2 %v342_v45 }
 0x197   :  { %343 = vpow2.f32 %v186_v46 }
 0x19d   :  { %v344_v47 = vpop.eup %343 }
 0x19e   :  { %194 = vadd.xlane.f32.xlu2 %v344_v47 }
 0x1a0   :  { %v177_v48 = vpop.xlane.xlu1 %176 }
 0x1a1   :  { %v182_v49 = vsub.f32 %v168_v37, %v177_v48 }
 0x1a3   :  { %v188_v50 = vmul.f32 1.442695, %v182_v49 }
 0x1a5   :  { %345 = vpow2.f32 %v188_v50 }
 0x1a8   :  { %v179_v51 = vpop.xlane.xlu1 %178 }
 0x1a9   :  { %v183_v52 = vsub.f32 %v170_v39, %v179_v51 }
 0x1ab   :  { %v471_v53 = vpop.eup %345  ;;  %v190_v54 = vmul.f32 1.442695, %v183_v52 }
 0x1ac   :  { %196 = vadd.xlane.f32.xlu0 %v471_v53 }
 0x1ad   :  { %347 = vpow2.f32 %v190_v54 }
 0x1b3   :  { %v474_v55 = vpop.eup %347 }
 0x1b4   :  { %198 = vadd.xlane.f32.xlu1 %v474_v55 }
 0x209   :  { %v193_v56 = vpop.xlane.xlu2 %192 }
 0x20a   :  { %349 = vrcp.f32 %v193_v56  ;;  %v211_v61 = vand.u32 2147483648, %v193_v56  ;;  %v209_v63 = vand.u32 2147483647, %v193_v56  ;;  %vm205_vm3 = vweird.f32 %v193_v56 }
 0x20c   :  { %v212_v2 = vor.u32 1.1754944e-38, %v211_v61  ;;  %vm210_vm5 = vcmp.eq.f32.partialorder %v209_v63, 8.507059e+37 }
 0x210   :  { %v350_v57 = vpop.eup %349 }
 0x211   :  { %v201_v58 = vmul.f32 %v350_v57, %v193_v56  ;;  %v195_v59 = vpop.xlane.xlu2 %194  ;;  %vm206_vm2 = vweird.f32 %v350_v57 }
 0x212   :  { %351 = vrcp.f32 %v195_v59  ;;  %vm207_vm4 = vmor %vm205_vm3, %vm206_vm2  ;;  %v226_v8 = vand.u32 2147483648, %v195_v59  ;;  %v224_v10 = vand.u32 2147483647, %v195_v59  ;;  %vm220_vm7 = vweird.f32 %v195_v59 }
 0x213   :  { %v202_v60 = vsub.f32 1.0, %v201_v58 }
 0x214   :  { %v227_v13 = vor.u32 1.1754944e-38, %v226_v8  ;;  %vm225_vm9 = vcmp.eq.f32.partialorder %v224_v10, 8.507059e+37 }
 0x215   :  { %v203_v62 = vmul.f32 %v350_v57, %v202_v60 }
 0x217   :  { %v204_v0 = vadd.f32 %v350_v57, %v203_v62 }
 0x218   :  { %v352_v1 = vpop.eup %351 }
 0x219   :  { %v208_v3 = vsel %vm207_vm4, %v350_v57, %v204_v0  ;;  %v216_v4 = vmul.f32 %v352_v1, %v195_v59  ;;  %vm221_vm6 = vweird.f32 %v352_v1 }
 0x21a   :  { %v213_v5 = vsel %vm210_vm5, %v212_v2, %v208_v3  ;;  %vm222_vm8 = vmor %vm220_vm7, %vm221_vm6 }
 0x21b   :  { %v214_v6 = vmul.f32 %v342_v45, %v213_v5  ;;  %v217_v7 = vsub.f32 1.0, %v216_v4 }
 0x21d   :  { %260 = vst [vmem:[#allocation5] sm:$0xff] %v214_v6  ;;  %v218_v9 = vmul.f32 %v352_v1, %v217_v7 }
 0x21f   :  { %v219_v11 = vadd.f32 %v352_v1, %v218_v9  ;;  %v197_v12 = vpop.xlane.xlu0 %196 }
 0x220   :  { %353 = vrcp.f32 %v197_v12  ;;  %v241_v21 = vand.u32 2147483648, %v197_v12  ;;  %v239_v23 = vand.u32 2147483647, %v197_v12  ;;  %vm235_vm11 = vweird.f32 %v197_v12 }
 0x221   :  { %v223_v14 = vsel %vm222_vm8, %v352_v1, %v219_v11 }
 0x222   :  { %v228_v15 = vsel %vm225_vm9, %v227_v13, %v223_v14  ;;  %v242_v26 = vor.u32 1.1754944e-38, %v241_v21  ;;  %vm240_vm13 = vcmp.eq.f32.partialorder %v239_v23, 8.507059e+37 }
 0x223   :  { %v229_v16 = vmul.f32 %v344_v47, %v228_v15 }
 0x225   :  { %261 = vst [vmem:[#allocation5 + $0x8] sm:$0xff] %v229_v16 }
 0x226   :  { %v354_v17 = vpop.eup %353 }
 0x227   :  { %v231_v18 = vmul.f32 %v354_v17, %v197_v12  ;;  %v199_v19 = vpop.xlane.xlu1 %198  ;;  %vm236_vm10 = vweird.f32 %v354_v17 }
 0x228   :  { %355 = vrcp.f32 %v199_v19  ;;  %vm237_vm12 = vmor %vm235_vm11, %vm236_vm10  ;;  %v256_v32 = vand.u32 2147483648, %v199_v19  ;;  %v254_v34 = vand.u32 2147483647, %v199_v19  ;;  %vm250_vm15 = vweird.f32 %v199_v19 }
 0x229   :  { %v232_v20 = vsub.f32 1.0, %v231_v18 }
 0x22a   :  { %v257_v36 = vor.u32 1.1754944e-38, %v256_v32  ;;  %vm255_vm1 = vcmp.eq.f32.partialorder %v254_v34, 8.507059e+37 }
 0x22b   :  { %v233_v22 = vmul.f32 %v354_v17, %v232_v20 }
 0x22d   :  { %v234_v24 = vadd.f32 %v354_v17, %v233_v22 }
 0x22e   :  { %v356_v25 = vpop.eup %355 }
 0x22f   :  { %v238_v27 = vsel %vm237_vm12, %v354_v17, %v234_v24  ;;  %v246_v28 = vmul.f32 %v356_v25, %v199_v19  ;;  %vm251_vm14 = vweird.f32 %v356_v25 }
 0x230   :  { %v243_v29 = vsel %vm240_vm13, %v242_v26, %v238_v27  ;;  %vm252_vm0 = vmor %vm250_vm15, %vm251_vm14 }
 0x231   :  { %v244_v30 = vmul.f32 %v471_v53, %v243_v29  ;;  %v247_v31 = vsub.f32 1.0, %v246_v28 }
 0x233   :  { %262 = vst [vmem:[#allocation5 + $0x10] sm:$0xff] %v244_v30  ;;  %v248_v33 = vmul.f32 %v356_v25, %v247_v31 }
 0x235   :  { %v249_v35 = vadd.f32 %v356_v25, %v248_v33 }
 0x237   :  { %v253_v37 = vsel %vm252_vm0, %v356_v25, %v249_v35 }
 0x238   :  { %v258_v38 = vsel %vm255_vm1, %v257_v36, %v253_v37 }
 0x239   :  { %v259_v39 = vmul.f32 %v474_v55, %v258_v38 }
 0x23b   :  { %263 = vst [vmem:[#allocation5 + $0x18] sm:$0xff] %v259_v39 }
 0x23c   :  { %276 = dma.vmem_to_hbm [thread:$0]  %s269_s4, 512, %s271_s13, [#allocation4], %s413_s14, %s413_s14, %s414_s15  }
 0x23d   :  { %407 = dma.done.wait [#allocation4], 512  }
 0x23e   :  { %408 = vsyncadd [#allocation4], 4294966784 }
 0x23f   :  { %281 = vsyncpa [#allocation3], 1 }
 0x240   :  { %282 = vsyncpa [#allocation4], 1 }

</bundles_post_ra>
